<compile_context>
chip_gen: v7x
topology: tpu7x:2x2x1
jax: 0.10.0
libtpu: 0.0.40
codegen_flags: <defaults>
</compile_context>

<pallas_src>
import functools

import jax
import jax.numpy as jnp
from jax.experimental import pallas as pl
from jax.experimental.pallas import tpu as pltpu

BN_EPS = 1e-5


def speaker_id_kernel(x_ref, mask_ref, w1_ref, b1_ref, w2_ref, b2_ref, w3_ref, b3_ref,
                      wf1_ref, bf1_ref, wf2_ref, bf2_ref, out_ref, *, seq_len, block_b):
    rows = block_b * seq_len                 # R: lane axis, column index r = b_local*T + t
    x = x_ref[0]                             # (cin, R) channels-first, rows-on-lanes
    not_first = mask_ref[0:1]                # (1, R) f32: 0.0 where t == 0, else 1.0
    not_last = mask_ref[1:2]                 # (1, R) f32: 0.0 where t == T-1, else 1.0

    def conv_bn_relu(h, w_ref, b_ref):
        # 'same'-padded 3-tap conv over T as ONE matmul: lane-roll the input by +-1, zero the
        # sample-boundary columns (this also kills roll wraparound across samples and across
        # batch padding), stack the taps on sublanes, multiply by the (Cout, 3*Cin) stacked
        # BN-folded weight.
        h_prev = pltpu.roll(h, 1, 1) * not_first          # h[:, r-1]  (tap t-1)
        h_next = pltpu.roll(h, rows - 1, 1) * not_last    # h[:, r+1]  (tap t+1)
        h_cat = jnp.concatenate([h_prev, h, h_next], axis=0)           # (3*Cin, R)
        y = jnp.dot(w_ref[...], h_cat, preferred_element_type=jnp.float32) + b_ref[...]
        return jnp.maximum(y, 0.0)                                     # (Cout, R)

    h = conv_bn_relu(x, w1_ref, b1_ref)      # (32, R)
    h = conv_bn_relu(h, w2_ref, b2_ref)      # (64, R)
    h = conv_bn_relu(h, w3_ref, b3_ref)      # (128, R)

    # AdaptiveAvgPool2d((1,1)) + Flatten: per-sample mean over T.  The 1/T factor is folded
    # into wf1 by the wrapper, so only a per-sample segment sum remains: transpose once to
    # (R, 128) (dense tiles, XLU work overlaps the MXU) and reduce each group of T rows.
    hT = jnp.transpose(h)                                              # (R, 128)
    pooled = jnp.sum(hT.reshape(block_b, seq_len, 128), axis=1)        # (bb, 128)

    # Dropout(0.2) is identity in eval mode; FC head on the pooled features.
    f = jnp.dot(pooled, wf1_ref[...], preferred_element_type=jnp.float32) + bf1_ref[...]
    f = jnp.maximum(f, 0.0)                                            # (bb, 64)
    out = jnp.dot(f, wf2_ref[...], preferred_element_type=jnp.float32) + bf2_ref[...]
    out_ref[0] = out.astype(out_ref.dtype)                             # (bb, emb_pad)


def speaker_id_embedding(x, params, rows_per_step=4096):
    """x: (B, T, input_dim) f32  ->  (B, embedding_dim) f32."""
    B, T, cin = x.shape
    emb = params["wf2"].shape[1]
    emb_pad = pl.cdiv(emb, 128) * 128

    # ---- T-aware batch block: target ~rows_per_step rows (= bb*T lanes) per grid step -----
    # No forced multi-step split for small batches (sequential steps on single-TC v5e/v6e);
    # big workloads get >1 parallel step automatically, which v7x shards across its 2 cores.
    # TODO(synk): for very long T (> rows_per_step) tile T inside the kernel with a halo and
    # a running pooled accumulator instead of processing a full sequence per step.
    bb = max(1, min(B, rows_per_step // max(T, 1)))
    nb = pl.cdiv(B, bb)
    bb = pl.cdiv(B, nb)                       # balance block sizes across steps
    Bp = nb * bb
    R = bb * T

    xp = x if Bp == B else jnp.pad(x, ((0, Bp - B), (0, 0), (0, 0)))
    # Channels-first, rows-on-lanes input: (nb, cin, R) with column index r = b_local*T + t.
    xt = jnp.transpose(xp.reshape(nb, bb, T, cin), (0, 3, 1, 2)).reshape(nb, cin, R)

    # Sample-boundary lane masks, identical for every grid step:
    # row 0 -> not_first (t != 0), row 1 -> not_last (t != T-1), as {0,1} f32.
    t_idx = jnp.arange(R, dtype=jnp.int32) % T
    bmask = jnp.stack([t_idx != 0, t_idx != T - 1]).astype(jnp.float32)      # (2, R)

    # ---- one-time parameter prep (outside the kernel, negligible) ------------------------
    w1 = params["w1"].reshape(-1, 32).T                  # (32, 3*cin)  stacked taps, (Cout, K)
    w2 = params["w2"].reshape(-1, 64).T                  # (64, 96)
    w3 = params["w3"].reshape(-1, 128).T                 # (128, 192)
    b1, b2, b3 = params["b1"].T, params["b2"].T, params["b3"].T              # (Cout, 1)
    wf1 = params["wf1"] * (1.0 / T)                      # (128, 64)   pool's 1/T folded in
    wf2 = jnp.pad(params["wf2"], ((0, 0), (0, emb_pad - emb)))               # lane-dense out
    bf2 = jnp.pad(params["bf2"], ((0, 0), (0, emb_pad - emb)))
    ops = [bmask, w1, b1, w2, b2, w3, b3, wf1, params["bf1"], wf2, bf2]

    def full_spec(a):
        nd = a.ndim
        return pl.BlockSpec(a.shape, lambda i, _nd=nd: (0,) * _nd)

    flops = (2 * Bp * T * (3 * cin * 32 + 96 * 64 + 192 * 128)
             + 2 * Bp * (128 * 64 + 64 * emb_pad))
    bytes_accessed = 4 * int(xt.size + sum(int(o.size) for o in ops) + Bp * emb_pad)
    cost = pl.CostEstimate(flops=flops, transcendentals=0, bytes_accessed=bytes_accessed)

    out = pl.pallas_call(
        functools.partial(speaker_id_kernel, seq_len=T, block_b=bb),
        out_shape=jax.ShapeDtypeStruct((nb, bb, emb_pad), jnp.float32),
        grid=(nb,),
        in_specs=[pl.BlockSpec((1, cin, R), lambda i: (i, 0, 0))]
                 + [full_spec(o) for o in ops],
        out_specs=pl.BlockSpec((1, bb, emb_pad), lambda i: (i, 0, 0)),
        compiler_params=pltpu.CompilerParams(
            dimension_semantics=("parallel",),
            vmem_limit_bytes=32 * 1024 * 1024),
        cost_estimate=cost,
    )(xt, *ops)
    return out.reshape(Bp, emb_pad)[:B, :emb]


def init_params(key, input_dim, embedding_dim):
    """Deterministic synthetic parameters; BatchNorm (eval mode) folded into conv weights."""
    keys = iter(jax.random.split(key, 32))

    def conv_bn(cin, cout):
        # PyTorch Conv2d weight layout: (Cout, Cin, kh=3, kw=3)
        w4 = 0.1 * jax.random.normal(next(keys), (cout, cin, 3, 3), jnp.float32)
        b_conv = 0.1 * jax.random.normal(next(keys), (cout,), jnp.float32)
        gamma = 1.0 + 0.1 * jax.random.normal(next(keys), (cout,), jnp.float32)
        beta = 0.1 * jax.random.normal(next(keys), (cout,), jnp.float32)
        r_mean = 0.1 * jax.random.normal(next(keys), (cout,), jnp.float32)
        r_var = 0.9 + 0.1 * jnp.abs(jax.random.normal(next(keys), (cout,), jnp.float32))
        # Width is 1 with padding 1 -> only the middle kw column (index 1) sees data.
        w_eff = jnp.transpose(w4[:, :, :, 1], (2, 1, 0))          # (3, Cin, Cout)
        scale = gamma / jnp.sqrt(r_var + BN_EPS)
        w_fused = w_eff * scale[None, None, :]
        b_fused = (b_conv - r_mean) * scale + beta
        return w_fused, b_fused.reshape(1, cout)

    w1, b1 = conv_bn(input_dim, 32)
    w2, b2 = conv_bn(32, 64)
    w3, b3 = conv_bn(64, 128)
    # PyTorch Linear weight layout: (out_features, in_features); y = x @ W.T + b
    wf1_t = 0.1 * jax.random.normal(next(keys), (64, 128), jnp.float32)
    bf1 = 0.1 * jax.random.normal(next(keys), (64,), jnp.float32)
    wf2_t = 0.1 * jax.random.normal(next(keys), (embedding_dim, 64), jnp.float32)
    bf2 = 0.1 * jax.random.normal(next(keys), (embedding_dim,), jnp.float32)
    return {
        "w1": w1, "b1": b1, "w2": w2, "b2": b2, "w3": w3, "b3": b3,
        "wf1": wf1_t.T, "bf1": bf1.reshape(1, 64),
        "wf2": wf2_t.T, "bf2": bf2.reshape(1, embedding_dim),
    }


def ref_forward(x, p):
    """Pure-JAX reference (explicit zero padding) for validation."""
    def conv(h, w, b):
        T = h.shape[1]
        hp = jnp.pad(h, ((0, 0), (1, 1), (0, 0)))
        y = (jnp.einsum("btc,cd->btd", hp[:, 0:T], w[0])
             + jnp.einsum("btc,cd->btd", hp[:, 1:T + 1], w[1])
             + jnp.einsum("btc,cd->btd", hp[:, 2:T + 2], w[2])) + b
        return jnp.maximum(y, 0.0)

    h = conv(x, p["w1"], p["b1"])
    h = conv(h, p["w2"], p["b2"])
    h = conv(h, p["w3"], p["b3"])
    pooled = jnp.mean(h, axis=1)
    f = jnp.maximum(pooled @ p["wf1"] + p["bf1"][0], 0.0)
    return f @ p["wf2"] + p["bf2"][0]


if __name__ == "__main__":
    B, T, input_dim, embedding_dim = 2, 16, 4, 32
    key = jax.random.PRNGKey(0)
    kx, kx2, kp = jax.random.split(key, 3)
    params = init_params(kp, input_dim, embedding_dim)

    # Small shape matching the module's expected input (B, seq, input_dim).
    x = jax.random.normal(kx, (B, T, input_dim), jnp.float32)
    out = jax.block_until_ready(speaker_id_embedding(x, params))
    assert out.shape == (B, embedding_dim), out.shape
    if not bool(jnp.allclose(out, ref_forward(x, params), rtol=1e-4, atol=1e-4)):
        raise AssertionError("Pallas kernel output does not match JAX reference (B=2)")

    # Larger batch, still a single grid step under the default rows budget.
    B2 = 20
    x2 = jax.random.normal(kx2, (B2, T, input_dim), jnp.float32)
    out2 = jax.block_until_ready(speaker_id_embedding(x2, params))
    assert out2.shape == (B2, embedding_dim), out2.shape
    if not bool(jnp.allclose(out2, ref_forward(x2, params), rtol=1e-4, atol=1e-4)):
        raise AssertionError("Pallas kernel output does not match JAX reference (B=20)")

    # Force a small rows budget to exercise the multi-step parallel grid + batch padding.
    out3 = jax.block_until_ready(speaker_id_embedding(x2, params, rows_per_step=128))
    assert out3.shape == (B2, embedding_dim), out3.shape
    if not bool(jnp.allclose(out3, ref_forward(x2, params), rtol=1e-4, atol=1e-4)):
        raise AssertionError("Pallas kernel output does not match JAX reference (multi-step)")

    print("KERNEL_OK")
</pallas_src>

<mosaic_0001>
module attributes {stable_mosaic.version = 11 : i64} {
  func.func @speaker_id_kernel(%arg0: i32, %arg1: memref<1x4x32xf32, #tpu.memory_space<vmem>>, %arg2: memref<2x32xf32, #tpu.memory_space<vmem>>, %arg3: memref<32x12xf32, #tpu.memory_space<vmem>>, %arg4: memref<32x1xf32, #tpu.memory_space<vmem>>, %arg5: memref<64x96xf32, #tpu.memory_space<vmem>>, %arg6: memref<64x1xf32, #tpu.memory_space<vmem>>, %arg7: memref<128x192xf32, #tpu.memory_space<vmem>>, %arg8: memref<128x1xf32, #tpu.memory_space<vmem>>, %arg9: memref<128x64xf32, #tpu.memory_space<vmem>>, %arg10: memref<1x64xf32, #tpu.memory_space<vmem>>, %arg11: memref<64x128xf32, #tpu.memory_space<vmem>>, %arg12: memref<1x128xf32, #tpu.memory_space<vmem>>, %arg13: memref<1x2x128xf32, #tpu.memory_space<vmem>>) attributes {dimension_semantics = [#tpu.dimension_semantics<parallel>], iteration_bounds = array<i64: 1>, scalar_prefetch = 0 : i64, scratch_operands = 0 : i64, tpu.core_type = #tpu.core_type<tc>, window_params = [{transform_indices = @transform_0, window_bounds = array<i64: 1, 4, 32>}, {pipeline_mode = #tpu.pipeline_mode<synchronous>, transform_indices = @transform_1, window_bounds = array<i64: 2, 32>}, {pipeline_mode = #tpu.pipeline_mode<synchronous>, transform_indices = @transform_2, window_bounds = array<i64: 32, 12>}, {pipeline_mode = #tpu.pipeline_mode<synchronous>, transform_indices = @transform_3, window_bounds = array<i64: 32, 1>}, {pipeline_mode = #tpu.pipeline_mode<synchronous>, transform_indices = @transform_4, window_bounds = array<i64: 64, 96>}, {pipeline_mode = #tpu.pipeline_mode<synchronous>, transform_indices = @transform_5, window_bounds = array<i64: 64, 1>}, {pipeline_mode = #tpu.pipeline_mode<synchronous>, transform_indices = @transform_6, window_bounds = array<i64: 128, 192>}, {pipeline_mode = #tpu.pipeline_mode<synchronous>, transform_indices = @transform_7, window_bounds = array<i64: 128, 1>}, {pipeline_mode = #tpu.pipeline_mode<synchronous>, transform_indices = @transform_8, window_bounds = array<i64: 128, 64>}, {pipeline_mode = #tpu.pipeline_mode<synchronous>, transform_indices = @transform_9, window_bounds = array<i64: 1, 64>}, {pipeline_mode = #tpu.pipeline_mode<synchronous>, transform_indices = @transform_10, window_bounds = array<i64: 64, 128>}, {pipeline_mode = #tpu.pipeline_mode<synchronous>, transform_indices = @transform_11, window_bounds = array<i64: 1, 128>}, {transform_indices = @transform_12, window_bounds = array<i64: 1, 2, 128>}]} {
    %c0 = arith.constant 0 : index
    %c0_0 = arith.constant 0 : index
    %c0_1 = arith.constant 0 : index
    %0 = vector.load %arg1[%c0, %c0_0, %c0_1] : memref<1x4x32xf32, #tpu.memory_space<vmem>>, vector<1x4x32xf32>
    %1 = vector.shape_cast %0 : vector<1x4x32xf32> to vector<4x32xf32>
    %c0_2 = arith.constant 0 : index
    %c0_3 = arith.constant 0 : index
    %2 = vector.load %arg2[%c0_2, %c0_3] : memref<2x32xf32, #tpu.memory_space<vmem>>, vector<1x32xf32>
    %c1 = arith.constant 1 : index
    %c0_4 = arith.constant 0 : index
    %3 = vector.load %arg2[%c1, %c0_4] : memref<2x32xf32, #tpu.memory_space<vmem>>, vector<1x32xf32>
    %c1_i32 = arith.constant 1 : i32
    %4 = tpu.dynamic_rotate %1 by %c1_i32 dim 1 : vector<4x32xf32>, i32 -> vector<4x32xf32>
    %5 = vector.broadcast %2 : vector<1x32xf32> to vector<4x32xf32>
    %6 = arith.mulf %4, %5 : vector<4x32xf32>
    %c31_i32 = arith.constant 31 : i32
    %7 = tpu.dynamic_rotate %1 by %c31_i32 dim 1 : vector<4x32xf32>, i32 -> vector<4x32xf32>
    %8 = vector.broadcast %3 : vector<1x32xf32> to vector<4x32xf32>
    %9 = arith.mulf %7, %8 : vector<4x32xf32>
    %10 = tpu.concatenate %6, %1, %9 in 0 : vector<4x32xf32>, vector<4x32xf32>, vector<4x32xf32> -> vector<12x32xf32>
    %c0_5 = arith.constant 0 : index
    %c0_6 = arith.constant 0 : index
    %11 = vector.load %arg3[%c0_5, %c0_6] : memref<32x12xf32, #tpu.memory_space<vmem>>, vector<32x12xf32>
    %cst = arith.constant dense<0.000000e+00> : vector<32x32xf32>
    %12 = tpu.matmul %11, %10, %cst {dimension_numbers = #tpu.dot_dimension_numbers<[1], [0], [0], [1], [0, 0, 1, 1], [], []>} : vector<32x12xf32>, vector<12x32xf32>, vector<32x32xf32> -> vector<32x32xf32>
    %c0_7 = arith.constant 0 : index
    %c0_8 = arith.constant 0 : index
    %13 = vector.load %arg4[%c0_7, %c0_8] : memref<32x1xf32, #tpu.memory_space<vmem>>, vector<32x1xf32>
    %14 = vector.broadcast %13 : vector<32x1xf32> to vector<32x32xf32>
    %15 = arith.addf %12, %14 : vector<32x32xf32>
    %cst_9 = arith.constant 0.000000e+00 : f32
    %16 = vector.broadcast %cst_9 : f32 to vector<32x32xf32>
    %17 = arith.maximumf %15, %16 : vector<32x32xf32>
    %c1_i32_10 = arith.constant 1 : i32
    %18 = tpu.dynamic_rotate %17 by %c1_i32_10 dim 1 : vector<32x32xf32>, i32 -> vector<32x32xf32>
    %19 = vector.broadcast %2 : vector<1x32xf32> to vector<32x32xf32>
    %20 = arith.mulf %18, %19 : vector<32x32xf32>
    %c31_i32_11 = arith.constant 31 : i32
    %21 = tpu.dynamic_rotate %17 by %c31_i32_11 dim 1 : vector<32x32xf32>, i32 -> vector<32x32xf32>
    %22 = vector.broadcast %3 : vector<1x32xf32> to vector<32x32xf32>
    %23 = arith.mulf %21, %22 : vector<32x32xf32>
    %24 = tpu.concatenate %20, %17, %23 in 0 : vector<32x32xf32>, vector<32x32xf32>, vector<32x32xf32> -> vector<96x32xf32>
    %c0_12 = arith.constant 0 : index
    %c0_13 = arith.constant 0 : index
    %25 = vector.load %arg5[%c0_12, %c0_13] : memref<64x96xf32, #tpu.memory_space<vmem>>, vector<64x96xf32>
    %cst_14 = arith.constant dense<0.000000e+00> : vector<64x32xf32>
    %26 = tpu.matmul %25, %24, %cst_14 {dimension_numbers = #tpu.dot_dimension_numbers<[1], [0], [0], [1], [0, 0, 1, 1], [], []>} : vector<64x96xf32>, vector<96x32xf32>, vector<64x32xf32> -> vector<64x32xf32>
    %c0_15 = arith.constant 0 : index
    %c0_16 = arith.constant 0 : index
    %27 = vector.load %arg6[%c0_15, %c0_16] : memref<64x1xf32, #tpu.memory_space<vmem>>, vector<64x1xf32>
    %28 = vector.broadcast %27 : vector<64x1xf32> to vector<64x32xf32>
    %29 = arith.addf %26, %28 : vector<64x32xf32>
    %cst_17 = arith.constant 0.000000e+00 : f32
    %30 = vector.broadcast %cst_17 : f32 to vector<64x32xf32>
    %31 = arith.maximumf %29, %30 : vector<64x32xf32>
    %c1_i32_18 = arith.constant 1 : i32
    %32 = tpu.dynamic_rotate %31 by %c1_i32_18 dim 1 : vector<64x32xf32>, i32 -> vector<64x32xf32>
    %33 = vector.broadcast %2 : vector<1x32xf32> to vector<64x32xf32>
    %34 = arith.mulf %32, %33 : vector<64x32xf32>
    %c31_i32_19 = arith.constant 31 : i32
    %35 = tpu.dynamic_rotate %31 by %c31_i32_19 dim 1 : vector<64x32xf32>, i32 -> vector<64x32xf32>
    %36 = vector.broadcast %3 : vector<1x32xf32> to vector<64x32xf32>
    %37 = arith.mulf %35, %36 : vector<64x32xf32>
    %38 = tpu.concatenate %34, %31, %37 in 0 : vector<64x32xf32>, vector<64x32xf32>, vector<64x32xf32> -> vector<192x32xf32>
    %c0_20 = arith.constant 0 : index
    %c0_21 = arith.constant 0 : index
    %39 = vector.load %arg7[%c0_20, %c0_21] : memref<128x192xf32, #tpu.memory_space<vmem>>, vector<128x192xf32>
    %cst_22 = arith.constant dense<0.000000e+00> : vector<128x32xf32>
    %40 = tpu.matmul %39, %38, %cst_22 {dimension_numbers = #tpu.dot_dimension_numbers<[1], [0], [0], [1], [0, 0, 1, 1], [], []>} : vector<128x192xf32>, vector<192x32xf32>, vector<128x32xf32> -> vector<128x32xf32>
    %c0_23 = arith.constant 0 : index
    %c0_24 = arith.constant 0 : index
    %41 = vector.load %arg8[%c0_23, %c0_24] : memref<128x1xf32, #tpu.memory_space<vmem>>, vector<128x1xf32>
    %42 = vector.broadcast %41 : vector<128x1xf32> to vector<128x32xf32>
    %43 = arith.addf %40, %42 : vector<128x32xf32>
    %cst_25 = arith.constant 0.000000e+00 : f32
    %44 = vector.broadcast %cst_25 : f32 to vector<128x32xf32>
    %45 = arith.maximumf %43, %44 : vector<128x32xf32>
    %46 = tpu.transpose %45, [1, 0] : vector<128x32xf32> -> vector<32x128xf32>
    %47 = vector.shape_cast %46 : vector<32x128xf32> to vector<2x16x128xf32>
    %cst_26 = arith.constant dense<0.000000e+00> : vector<2x128xf32>
    %48 = vector.multi_reduction <add>, %47, %cst_26 [1] : vector<2x16x128xf32> to vector<2x128xf32>
    %c0_27 = arith.constant 0 : index
    %c0_28 = arith.constant 0 : index
    %49 = vector.load %arg9[%c0_27, %c0_28] : memref<128x64xf32, #tpu.memory_space<vmem>>, vector<128x64xf32>
    %cst_29 = arith.constant dense<0.000000e+00> : vector<2x64xf32>
    %50 = tpu.matmul %48, %49, %cst_29 {dimension_numbers = #tpu.dot_dimension_numbers<[1], [0], [0], [1], [0, 0, 1, 1], [], []>} : vector<2x128xf32>, vector<128x64xf32>, vector<2x64xf32> -> vector<2x64xf32>
    %c0_30 = arith.constant 0 : index
    %c0_31 = arith.constant 0 : index
    %51 = vector.load %arg10[%c0_30, %c0_31] : memref<1x64xf32, #tpu.memory_space<vmem>>, vector<1x64xf32>
    %52 = vector.broadcast %51 : vector<1x64xf32> to vector<2x64xf32>
    %53 = arith.addf %50, %52 : vector<2x64xf32>
    %cst_32 = arith.constant 0.000000e+00 : f32
    %54 = vector.broadcast %cst_32 : f32 to vector<2x64xf32>
    %55 = arith.maximumf %53, %54 : vector<2x64xf32>
    %c0_33 = arith.constant 0 : index
    %c0_34 = arith.constant 0 : index
    %56 = vector.load %arg11[%c0_33, %c0_34] : memref<64x128xf32, #tpu.memory_space<vmem>>, vector<64x128xf32>
    %cst_35 = arith.constant dense<0.000000e+00> : vector<2x128xf32>
    %57 = tpu.matmul %55, %56, %cst_35 {dimension_numbers = #tpu.dot_dimension_numbers<[1], [0], [0], [1], [0, 0, 1, 1], [], []>} : vector<2x64xf32>, vector<64x128xf32>, vector<2x128xf32> -> vector<2x128xf32>
    %c0_36 = arith.constant 0 : index
    %c0_37 = arith.constant 0 : index
    %58 = vector.load %arg12[%c0_36, %c0_37] : memref<1x128xf32, #tpu.memory_space<vmem>>, vector<1x128xf32>
    %59 = vector.broadcast %58 : vector<1x128xf32> to vector<2x128xf32>
    %60 = arith.addf %57, %59 : vector<2x128xf32>
    %c0_38 = arith.constant 0 : index
    %c0_39 = arith.constant 0 : index
    %c0_40 = arith.constant 0 : index
    %61 = vector.load %arg13[%c0_38, %c0_39, %c0_40] : memref<1x2x128xf32, #tpu.memory_space<vmem>>, vector<1x2x128xf32>
    %62 = vector.shape_cast %61 : vector<1x2x128xf32> to vector<2x128xf32>
    %63 = vector.shape_cast %60 : vector<2x128xf32> to vector<1x2x128xf32>
    tpu.vector_store %arg13[%c0_38, %c0_39, %c0_40], %63 {strides = array<i32>} : memref<1x2x128xf32, #tpu.memory_space<vmem>>, vector<1x2x128xf32>,
    return
  }
  func.func @transform_0(%arg0: i32) -> (i32, i32, i32) {
    %c0_i32 = arith.constant 0 : i32
    %c0_i32_0 = arith.constant 0 : i32
    %c0_i32_1 = arith.constant 0 : i32
    return %arg0, %c0_i32, %c0_i32_0 : i32, i32, i32
  }
  func.func @transform_1(%arg0: i32) -> (i32, i32) {
    %c0_i32 = arith.constant 0 : i32
    %c0_i32_0 = arith.constant 0 : i32
    %c0_i32_1 = arith.constant 0 : i32
    return %c0_i32, %c0_i32_0 : i32, i32
  }
  func.func @transform_2(%arg0: i32) -> (i32, i32) {
    %c0_i32 = arith.constant 0 : i32
    %c0_i32_0 = arith.constant 0 : i32
    %c0_i32_1 = arith.constant 0 : i32
    return %c0_i32, %c0_i32_0 : i32, i32
  }
  func.func @transform_3(%arg0: i32) -> (i32, i32) {
    %c0_i32 = arith.constant 0 : i32
    %c0_i32_0 = arith.constant 0 : i32
    %c0_i32_1 = arith.constant 0 : i32
    return %c0_i32, %c0_i32_0 : i32, i32
  }
  func.func @transform_4(%arg0: i32) -> (i32, i32) {
    %c0_i32 = arith.constant 0 : i32
    %c0_i32_0 = arith.constant 0 : i32
    %c0_i32_1 = arith.constant 0 : i32
    return %c0_i32, %c0_i32_0 : i32, i32
  }
  func.func @transform_5(%arg0: i32) -> (i32, i32) {
    %c0_i32 = arith.constant 0 : i32
    %c0_i32_0 = arith.constant 0 : i32
    %c0_i32_1 = arith.constant 0 : i32
    return %c0_i32, %c0_i32_0 : i32, i32
  }
  func.func @transform_6(%arg0: i32) -> (i32, i32) {
    %c0_i32 = arith.constant 0 : i32
    %c0_i32_0 = arith.constant 0 : i32
    %c0_i32_1 = arith.constant 0 : i32
    return %c0_i32, %c0_i32_0 : i32, i32
  }
  func.func @transform_7(%arg0: i32) -> (i32, i32) {
    %c0_i32 = arith.constant 0 : i32
    %c0_i32_0 = arith.constant 0 : i32
    %c0_i32_1 = arith.constant 0 : i32
    return %c0_i32, %c0_i32_0 : i32, i32
  }
  func.func @transform_8(%arg0: i32) -> (i32, i32) {
    %c0_i32 = arith.constant 0 : i32
    %c0_i32_0 = arith.constant 0 : i32
    %c0_i32_1 = arith.constant 0 : i32
    return %c0_i32, %c0_i32_0 : i32, i32
  }
  func.func @transform_9(%arg0: i32) -> (i32, i32) {
    %c0_i32 = arith.constant 0 : i32
    %c0_i32_0 = arith.constant 0 : i32
    %c0_i32_1 = arith.constant 0 : i32
    return %c0_i32, %c0_i32_0 : i32, i32
  }
  func.func @transform_10(%arg0: i32) -> (i32, i32) {
    %c0_i32 = arith.constant 0 : i32
    %c0_i32_0 = arith.constant 0 : i32
    %c0_i32_1 = arith.constant 0 : i32
    return %c0_i32, %c0_i32_0 : i32, i32
  }
  func.func @transform_11(%arg0: i32) -> (i32, i32) {
    %c0_i32 = arith.constant 0 : i32
    %c0_i32_0 = arith.constant 0 : i32
    %c0_i32_1 = arith.constant 0 : i32
    return %c0_i32, %c0_i32_0 : i32, i32
  }
  func.func @transform_12(%arg0: i32) -> (i32, i32, i32) {
    %c0_i32 = arith.constant 0 : i32
    %c0_i32_0 = arith.constant 0 : i32
    %c0_i32_1 = arith.constant 0 : i32
    return %arg0, %c0_i32, %c0_i32_0 : i32, i32, i32
  }
}

</mosaic_0001>

<bundles_post_ra>
// kernel: tpu_custom_call.1
= control target key start
LH: loop header
LB: loop body
LE: loop exit
PB: predicated region body
PF: predicated region fallthrough
CT: control target
= control target key end

     0   :  { %s1766_s25 = smov 32   ;;  %s1767_s26 = smov 1   ;;  %s2368_s0 = inlined_call_operand.vmem [shape: f32[1,4,32], index: 0, kind: input, shape index: {}]   ;;  %s2369_s1 = inlined_call_operand.vmem [shape: f32[2,32], index: 1, kind: input, shape index: {}]   ;;  %s2370_s2 = inlined_call_operand.vmem [shape: f32[32,12], index: 2, kind: input, shape index: {}]   ;;  %s2371_s3 = inlined_call_operand.vmem [shape: f32[32,1], index: 3, kind: input, shape index: {}]   ;;  %s2372_s4 = inlined_call_operand.vmem [shape: f32[64,96], index: 4, kind: input, shape index: {}]   ;;  %s2373_s5 = inlined_call_operand.vmem [shape: f32[64,1], index: 5, kind: input, shape index: {}]   ;;  %s2374_s6 = inlined_call_operand.vmem [shape: f32[128,192], index: 6, kind: input, shape index: {}]   ;;  %s2375_s7 = inlined_call_operand.vmem [shape: f32[128,1], index: 7, kind: input, shape index: {}]   ;;  %s2376_s8 = inlined_call_operand.vmem [shape: f32[128,64], index: 8, kind: input, shape index: {}]   ;;  %s2377_s9 = inlined_call_operand.vmem [shape: f32[1,64], index: 9, kind: input, shape index: {}]   ;;  %s2378_s10 = inlined_call_operand.vmem [shape: f32[64,128], index: 10, kind: input, shape index: {}]   ;;  %s2379_s11 = inlined_call_operand.vmem [shape: f32[1,128], index: 11, kind: input, shape index: {}]   ;;  %s2380_s12 = inlined_call_operand.hbm [shape: f32[1,2,128], index: 12, kind: output, shape index: {}]  }
   0x1   :  { %v42_v0 = vld [vmem:[%s2368_s0] sm:$0xf] }
   0x2   :  { %v1287_v1 = vld [vmem:[%s2369_s1 + $0x1] ss:$0 sm:$0xff]  ;;  %46 = vrot.lane.b32.xlu0 %v42_v0, %s1766_s25  ;;  %v1286_v2 = vld [vmem:[%s2369_s1] ss:$0 sm:$0xff] }
   0x3   :  { %66 = vrot.lane.b32.xlu1 %v1287_v1, %s1767_s26 }
   0x4   :  { %17 = vsyncpa [#allocation3], 0  ;;  %s1768_s29 = smov 31   ;;  %vm45_vm0 = vcmask 1047808   ;;  %v71_v5 = vrot.slane %v42_v0, 4  ;;  %s1769_s0 = smov 30  }
   0x5   :  { %v80_v11 = vld [vmem:[%s2370_s2] sm:$0xff]  ;;  %vm114_vm1 = vcmask 97280   ;;  %vm78_vm2 = vcmask 1043456   ;;  %s1770_s15 = smov 97   ;;  %v1771_v18 = vmov 0   ;;  %v85_v19 = vld [vmem:[%s2371_s3 + $0x8] sm:$0xff] }
   0x6   :  { %1376 = vmatprep.mubr.msk.f32.mxu1 %vm114_vm1, %v80_v11  ;;  %v84_v17 = vld [vmem:[%s2371_s3] sm:$0xff]  ;;  %1590 = vset.pattern.permute.xlu1 %v1771_v18  ;;  %v86_v20 = vld [vmem:[%s2371_s3 + $0x10] sm:$0xff]  ;;  %v87_v21 = vld [vmem:[%s2371_s3 + $0x18] sm:$0xff]  ;;  %vm1772_vm3 = vmmov 1   ;;  %vm370_vm5 = vcmask 785408   ;;  %vm828_vm6 = vcmask 523264  }
   0x7   :  { %57 = vrot.lane.b32.xlu1 %v1286_v2, %s1768_s29  ;;  %1591 = vset.pattern.permute.xlu0 %v1771_v18  ;;  %vm1473_vm4 = vmpackc.low %vm78_vm2, %vm1772_vm3  ;;  %v81_v26 = vld [vmem:[%s2370_s2 + $0x8] sm:$0xff]  ;;  %v82_v27 = vld [vmem:[%s2370_s2 + $0x10] sm:$0xff]  ;;  %vm1774_vm7 = vmmov 0   ;;  %vm1109_vm8 = vcmask 1041409   ;;  %s1776_s19 = smov [#allocation2]  }
   0x8   :  { %v83_v28 = vld [vmem:[%s2370_s2 + $0x18] sm:$0xff]  ;;  %s1278_s20 = sshll.u32 %s1776_s19, 4  ;;  %s1279_s20 = int_to_ptr.vmem [resolvable:$true] %s1278_s20 }
   0x9   :  { %p1747_p1 = scmp.lt.s32.totalorder %s1279_s20, %s1279_s20 }
  0x74   :  { %v47_v3 = vpop.permute.xlu0 %46 }
  0x75   :  { %v48_v4 = vsel %vm45_vm0, %v47_v3, %v42_v0  ;;  %v1856_v7 = vpop.permute.xlu1 %66 }
  0x76   :  { %49 = vrot.lane.b32.xlu0 %v48_v4, %s1766_s25 }
  0x79   :  { %v1861_v10 = vpop.permute.xlu1 %57 }
  0x7a   :  { %72 = vrot.lane.b32.xlu0 %v71_v5, %s1768_s29 }
  0xe8   :  { %v50_v6 = vpop.permute.xlu0 %49 }
  0xe9   :  { %v51_v8 = vsel %vm45_vm0, %v50_v6, %v42_v0 }
  0xea   :  { %v69_v9 = vmul.f32 %v1856_v7, %v51_v8  ;;  %v60_v12 = vmul.f32 %v1861_v10, %v51_v8 }
  0xec   :  { %76 = vrot.lane.b32.xlu1 %v69_v9, %s1769_s0  ;;  %v73_v13 = vpop.permute.xlu0 %72 }
  0xed   :  { %v79_v15 = vsel %vm78_vm2, %v60_v12, %v73_v13 }
  0xf0   :  { %90 = vperm.xlu1 %1590, %v84_v17  }
  0xf4   :  { %100 = vperm.xlu1 %1590, %v86_v20  }
  0xf8   :  { %105 = vperm.xlu1 %1590, %v87_v21  }
 0x15e   :  { %v77_v14 = vpop.permute.xlu1 %76 }
 0x15f   :  { %v1585_v16 = vpack.i.bf16 %v77_v14, %v79_v15 }
 0x161   :  { %1586 = vrot.lane.b32.xlu0 %v1585_v16, %s1770_s15  ;;  %v274_v16 = vld [vmem:[%s2372_s4] sm:$0xff] }
 0x165   :  { %95 = vperm.xlu0 %1591, %v85_v19  }
 0x16f   :  { %v91_v29 = vpop.permute.xlu1 %90 }
 0x173   :  { %v101_v30 = vpop.permute.xlu1 %100 }
 0x177   :  { %v106_v37 = vpop.permute.xlu1 %105 }
 0x1d3   :  { %v1587_v22 = vpop.permute.xlu0 %1586 }
 0x1d4   :  { %v1589_v23 = vunpack.i.h.bf16 %v1587_v22  ;;  %v1588_v24 = vunpack.i.l.bf16 %v1587_v22  ;;  %v282_v22 = vld [vmem:[%s2373_s5] sm:$0xff] }
 0x1d6   :  { %v1472_v25 = vpack.c.bf16 %v1589_v23, %v1588_v24 }
 0x1d8   :  { %1474 = vmatprep.subr.msk.bf16.mxu1 %vm1473_vm4, %v1472_v25 }
 0x1d9   :  { %1477 = vmatpush3.bf16.msk.msra.mxu1 %vm1473_vm4, %v1472_v25 }
 0x1dc   :  { %1377 = vmatmul.mubr.msk.f32.vlgmr.msra.gmra.mrb[0].mxu1 %vm114_vm1, %v81_v26 }
 0x1dd   :  { %1379 = vmatprep.mubr.msk.f32.mxu1 %vm114_vm1, %v82_v27 }
 0x1e0   :  { %1380 = vmatmul.mubr.msk.f32.gmra.mrb[2].mxu1 %vm114_vm1, %v83_v28 }
 0x1e1   :  { %1406 = vmatprep.mubr.msk.f32.mxu1 %vm370_vm5, %v274_v16 }
 0x1e4   :  { %v96_v31 = vpop.permute.xlu0 %95 }
 0x2af   :  { %v1378_v32 = vpop.f32.mrb[0].mxu1 }
 0x2b0   :  { %v201_v33 = vadd.f32 %v1378_v32, %v96_v31  ;;  %v195_v34 = vpop.f32.mrb[1].mxu1  ;;  %v284_v31 = vld [vmem:[%s2373_s5 + $0x10] sm:$0xff] }
 0x2b1   :  { %v196_v35 = vadd.f32 %v195_v34, %v91_v29  ;;  %v283_v29 = vld [vmem:[%s2373_s5 + $0x8] sm:$0xff] }
 0x2b2   :  { %v215_v36 = vmax.f32 %v201_v33, 0.0 }
 0x2b3   :  { %v214_v38 = vmax.f32 %v196_v35, 0.0  ;;  %v1381_v39 = vpop.f32.mrb[2].mxu1 }
 0x2b4   :  { %v211_v40 = vadd.f32 %v1381_v39, %v106_v37  ;;  %221 = vrot.lane.b32.xlu1 %v215_v36, %s1766_s25  ;;  %v205_v41 = vpop.f32.mrb[3].mxu1  ;;  %v286_v37 = vld [vmem:[%s2373_s5 + $0x20] sm:$0xff]  ;;  %v287_v39 = vld [vmem:[%s2373_s5 + $0x28] sm:$0xff] }
 0x2b5   :  { %v206_v42 = vadd.f32 %v205_v41, %v101_v30  ;;  %218 = vrot.lane.b32.xlu0 %v214_v38, %s1766_s25  ;;  %v1592_v54 = vpack.i.bf16 %v215_v36, %v214_v38  ;;  %v289_v41 = vld [vmem:[%s2373_s5 + $0x38] sm:$0xff] }
 0x2b6   :  { %v217_v43 = vmax.f32 %v211_v40, 0.0  ;;  %v288_v40 = vld [vmem:[%s2373_s5 + $0x30] sm:$0xff] }
 0x2b7   :  { %v216_v44 = vmax.f32 %v206_v42, 0.0 }
 0x2b8   :  { %227 = vrot.lane.b32.xlu1 %v217_v43, %s1766_s25 }
 0x2b9   :  { %224 = vrot.lane.b32.xlu0 %v216_v44, %s1766_s25  ;;  %v1597_v53 = vpack.i.bf16 %v217_v43, %v216_v44 }
 0x326   :  { %v222_v45 = vpop.permute.xlu1 %221 }
 0x327   :  { %v219_v46 = vpop.permute.xlu0 %218  ;;  %v223_v47 = vsel %vm45_vm0, %v222_v45, %v215_v36 }
 0x328   :  { %232 = vrot.lane.b32.xlu1 %v223_v47, %s1766_s25  ;;  %v220_v48 = vsel %vm45_vm0, %v219_v46, %v214_v38 }
 0x329   :  { %230 = vrot.lane.b32.xlu0 %v220_v48, %s1766_s25 }
 0x32a   :  { %v228_v49 = vpop.permute.xlu1 %227 }
 0x32b   :  { %v225_v50 = vpop.permute.xlu0 %224  ;;  %v229_v51 = vsel %vm45_vm0, %v228_v49, %v217_v43 }
 0x32c   :  { %236 = vrot.lane.b32.xlu1 %v229_v51, %s1766_s25  ;;  %v226_v52 = vsel %vm45_vm0, %v225_v50, %v216_v44  ;;  %v275_v50 = vld [vmem:[%s2372_s4 + $0x8] sm:$0xff]  ;;  %v276_v51 = vld [vmem:[%s2372_s4 + $0x10] sm:$0xff] }
 0x32d   :  { %234 = vrot.lane.b32.xlu0 %v226_v52, %s1766_s25  ;;  %v277_v52 = vld [vmem:[%s2372_s4 + $0x18] sm:$0xff] }
 0x330   :  { %1598 = vrot.lane.b32.xlu1 %v1597_v53, %s1768_s29  ;;  %v278_v53 = vld [vmem:[%s2372_s4 + $0x20] sm:$0xff] }
 0x331   :  { %1593 = vrot.lane.b32.xlu0 %v1592_v54, %s1768_s29  ;;  %v279_v54 = vld [vmem:[%s2372_s4 + $0x28] sm:$0xff] }
 0x39a   :  { %v233_v55 = vpop.permute.xlu1 %232 }
 0x39b   :  { %v239_v56 = vsel %vm45_vm0, %v233_v55, %v215_v36  ;;  %v231_v57 = vpop.permute.xlu0 %230  ;;  %v285_v36 = vld [vmem:[%s2373_s5 + $0x18] sm:$0xff]  ;;  %v280_v55 = vld [vmem:[%s2372_s4 + $0x30] sm:$0xff] }
 0x39c   :  { %v247_v58 = vmul.f32 %v239_v56, %v1856_v7  ;;  %v238_v59 = vsel %vm45_vm0, %v231_v57, %v214_v38  ;;  %v243_v62 = vmul.f32 %v239_v56, %v1861_v10  ;;  %v281_v56 = vld [vmem:[%s2372_s4 + $0x38] sm:$0xff] }
 0x39d   :  { %v246_v60 = vmul.f32 %v238_v59, %v1856_v7  ;;  %v242_v63 = vmul.f32 %v238_v59, %v1861_v10 }
 0x39e   :  { %v237_v61 = vpop.permute.xlu1 %236 }
 0x39f   :  { %v241_v0 = vsel %vm45_vm0, %v237_v61, %v217_v43  ;;  %v235_v1 = vpop.permute.xlu0 %234  ;;  %v1602_v2 = vpack.i.bf16 %v247_v58, %v246_v60  ;;  %v1612_v11 = vpack.i.bf16 %v243_v62, %v242_v63 }
 0x3a0   :  { %v249_v3 = vmul.f32 %v241_v0, %v1856_v7  ;;  %v240_v4 = vsel %vm45_vm0, %v235_v1, %v216_v44  ;;  %v245_v6 = vmul.f32 %v241_v0, %v1861_v10 }
 0x3a1   :  { %v248_v5 = vmul.f32 %v240_v4, %v1856_v7  ;;  %1603 = vrot.lane.b32.xlu0 %v1602_v2, %s1769_s0  ;;  %v244_v8 = vmul.f32 %v240_v4, %v1861_v10 }
 0x3a2   :  { %v1599_v13 = vpop.permute.xlu1 %1598 }
 0x3a3   :  { %v1594_v9 = vpop.permute.xlu0 %1593  ;;  %v1607_v12 = vpack.i.bf16 %v249_v3, %v248_v5  ;;  %v1617_v14 = vpack.i.bf16 %v245_v6, %v244_v8 }
 0x3a5   :  { %1613 = vrot.lane.b32.xlu0 %v1612_v11, %s1770_s15  ;;  %1608 = vrot.lane.b32.xlu1 %v1607_v12, %s1769_s0 }
 0x3a9   :  { %1618 = vrot.lane.b32.xlu1 %v1617_v14, %s1770_s15  ;;  %1623 = vrot.lane.b32.xlu0 %v1594_v9, %s1770_s15 }
 0x3ad   :  { %1628 = vrot.lane.b32.xlu1 %v1599_v13, %s1770_s15 }
 0x413   :  { %v1604_v15 = vpop.permute.xlu0 %1603 }
 0x414   :  { %1633 = vrot.lane.b32.xlu0 %v1604_v15, %s1770_s15 }
 0x417   :  { %v1609_v17 = vpop.permute.xlu1 %1608  ;;  %v1614_v18 = vpop.permute.xlu0 %1613 }
 0x418   :  { %v1616_v19 = vunpack.i.h.bf16 %v1614_v18  ;;  %v1615_v20 = vunpack.i.l.bf16 %v1614_v18  ;;  %1638 = vrot.lane.b32.xlu1 %v1609_v17, %s1770_s15  ;;  %292 = vperm.xlu0 %1591, %v282_v22  }
 0x41a   :  { %v1478_v21 = vpack.c.bf16 %v1616_v19, %v1615_v20 }
 0x41b   :  { %v1619_v23 = vpop.permute.xlu1 %1618  ;;  %v1624_v24 = vpop.permute.xlu0 %1623 }
 0x41c   :  { %v1621_v25 = vunpack.i.h.bf16 %v1619_v23  ;;  %v1620_v26 = vunpack.i.l.bf16 %v1619_v23  ;;  %v1626_v27 = vunpack.i.h.bf16 %v1624_v24  ;;  %v1625_v28 = vunpack.i.l.bf16 %v1624_v24  ;;  %1479 = vmatprep.subr.bf16.mxu1 %v1478_v21  ;;  %297 = vperm.xlu1 %1590, %v283_v29  }
 0x41d   :  { %1481 = vmatpush3.bf16.msra.mxu1 %v1478_v21  ;;  %302 = vperm.xlu0 %1591, %v284_v31  }
 0x41e   :  { %v1482_v30 = vpack.c.bf16 %v1621_v25, %v1620_v26  ;;  %v1486_v33 = vpack.c.bf16 %v1626_v27, %v1625_v28 }
 0x41f   :  { %v1629_v32 = vpop.permute.xlu1 %1628 }
 0x420   :  { %v1631_v34 = vunpack.i.h.bf16 %v1629_v32  ;;  %v1630_v35 = vunpack.i.l.bf16 %v1629_v32  ;;  %1483 = vmatprep.subr.bf16.mxu1 %v1482_v30  ;;  %307 = vperm.xlu1 %1590, %v285_v36  }
 0x421   :  { %1485 = vmatpush3.bf16.msra.mxu1 %v1482_v30  ;;  %312 = vperm.xlu0 %1591, %v286_v37  }
 0x422   :  { %1487 = vmatprep.subr.bf16.mxu1 %v1486_v33  ;;  %v1490_v38 = vpack.c.bf16 %v1631_v34, %v1630_v35 }
 0x424   :  { %317 = vperm.xlu1 %1590, %v287_v39  }
 0x425   :  { %1489 = vmatpush3.bf16.msra.mxu1 %v1486_v33  ;;  %322 = vperm.xlu0 %1591, %v288_v40  }
 0x426   :  { %1491 = vmatprep.subr.bf16.mxu1 %v1490_v38 }
 0x428   :  { %327 = vperm.xlu1 %1590, %v289_v41  }
 0x429   :  { %1493 = vmatpush3.bf16.msra.mxu1 %v1490_v38 }
 0x486   :  { %v1634_v42 = vpop.permute.xlu0 %1633 }
 0x487   :  { %v1636_v43 = vunpack.i.h.bf16 %v1634_v42  ;;  %v1635_v44 = vunpack.i.l.bf16 %v1634_v42 }
 0x489   :  { %v1494_v45 = vpack.c.bf16 %v1636_v43, %v1635_v44 }
 0x48a   :  { %v1639_v46 = vpop.permute.xlu1 %1638 }
 0x48b   :  { %v1641_v47 = vunpack.i.h.bf16 %v1639_v46  ;;  %v1640_v48 = vunpack.i.l.bf16 %v1639_v46  ;;  %1495 = vmatprep.subr.bf16.mxu1 %v1494_v45 }
 0x48c   :  { %1497 = vmatpush3.bf16.msra.mxu1 %v1494_v45 }
 0x48d   :  { %v1498_v49 = vpack.c.bf16 %v1641_v47, %v1640_v48 }
 0x48f   :  { %1499 = vmatprep.subr.bf16.mxu1 %v1498_v49 }
 0x490   :  { %1501 = vmatpush3.bf16.msra.mxu1 %v1498_v49 }
 0x493   :  { %1407 = vmatmul.mubr.msk.f32.vlgmr.msra.gmra.mrb[4].mxu1 %vm370_vm5, %v275_v50 }
 0x494   :  { %1409 = vmatprep.mubr.msk.f32.mxu1 %vm370_vm5, %v276_v51 }
 0x497   :  { %1410 = vmatmul.mubr.msk.f32.gmra.mrb[6].mxu1 %vm370_vm5, %v277_v52  ;;  %v293_v58 = vpop.permute.xlu0 %292 }
 0x498   :  { %1412 = vmatprep.mubr.msk.f32.mxu1 %vm370_vm5, %v278_v53 }
 0x49b   :  { %1413 = vmatmul.mubr.msk.f32.gmra.mrb[8].mxu1 %vm370_vm5, %v279_v54  ;;  %v298_v57 = vpop.permute.xlu1 %297 }
 0x49c   :  { %1415 = vmatprep.mubr.msk.f32.mxu1 %vm370_vm5, %v280_v55  ;;  %v303_v61 = vpop.permute.xlu0 %302 }
 0x49f   :  { %1416 = vmatmul.mubr.msk.f32.gmra.mrb[10].mxu1 %vm370_vm5, %v281_v56  ;;  %v308_v59 = vpop.permute.xlu1 %307 }
 0x4a0   :  { %v313_v9 = vpop.permute.xlu0 %312 }
 0x4a3   :  { %v318_v6 = vpop.permute.xlu1 %317 }
 0x4a4   :  { %v323_v21 = vpop.permute.xlu0 %322 }
 0x4a7   :  { %v328_v18 = vpop.permute.xlu1 %327 }
 0x566   :  { %v1408_v60 = vpop.f32.mrb[4].mxu1 }
 0x567   :  { %v467_v62 = vadd.f32 %v1408_v60, %v298_v57  ;;  %v461_v63 = vpop.f32.mrb[5].mxu1 }
 0x568   :  { %v462_v0 = vadd.f32 %v461_v63, %v293_v58 }
 0x569   :  { %v1985_v1 = vmax.f32 %v467_v62, 0.0 }
 0x56a   :  { %v1987_v2 = vmax.f32 %v462_v0, 0.0  ;;  %v1411_v3 = vpop.f32.mrb[6].mxu1  ;;  %v1773_v0 = vmov 0.0|0.0  }
 0x56b   :  { %v477_v4 = vadd.f32 %v1411_v3, %v308_v59  ;;  %511 = vrot.lane.b32.xlu1 %v1985_v1, %s1766_s25  ;;  %v471_v5 = vpop.f32.mrb[7].mxu1  ;;  %1502 = vmatprep.subr.bf16.mxu0 %v1773_v0 }
 0x56c   :  { %v472_v8 = vadd.f32 %v471_v5, %v303_v61  ;;  %508 = vrot.lane.b32.xlu0 %v1987_v2, %s1766_s25  ;;  %v1642_v44 = vpack.i.bf16 %v1985_v1, %v1987_v2  ;;  %1538 = vmatprep.subr.bf16.mxu1 %v1773_v0 }
 0x56d   :  { %v503_v11 = vmax.f32 %v477_v4, 0.0 }
 0x56e   :  { %v1993_v12 = vmax.f32 %v472_v8, 0.0  ;;  %v1414_v13 = vpop.f32.mrb[8].mxu1 }
 0x56f   :  { %v487_v14 = vadd.f32 %v1414_v13, %v318_v6  ;;  %517 = vrot.lane.b32.xlu1 %v503_v11, %s1766_s25  ;;  %v481_v15 = vpop.f32.mrb[9].mxu1 }
 0x570   :  { %v482_v16 = vadd.f32 %v481_v15, %v313_v9  ;;  %514 = vrot.lane.b32.xlu0 %v1993_v12, %s1766_s25  ;;  %v1647_v43 = vpack.i.bf16 %v503_v11, %v1993_v12 }
 0x571   :  { %v505_v17 = vmax.f32 %v487_v14, 0.0 }
 0x572   :  { %v1998_v19 = vmax.f32 %v482_v16, 0.0  ;;  %v1417_v20 = vpop.f32.mrb[10].mxu1 }
 0x573   :  { %v497_v22 = vadd.f32 %v1417_v20, %v328_v18  ;;  %523 = vrot.lane.b32.xlu1 %v505_v17, %s1766_s25  ;;  %v491_v23 = vpop.f32.mrb[11].mxu1 }
 0x574   :  { %v492_v24 = vadd.f32 %v491_v23, %v323_v21  ;;  %520 = vrot.lane.b32.xlu0 %v1998_v19, %s1766_s25  ;;  %v1652_v46 = vpack.i.bf16 %v505_v17, %v1998_v19 }
 0x575   :  { %v2003_v25 = vmax.f32 %v497_v22, 0.0 }
 0x576   :  { %v2005_v26 = vmax.f32 %v492_v24, 0.0 }
 0x577   :  { %529 = vrot.lane.b32.xlu1 %v2003_v25, %s1766_s25 }
 0x578   :  { %526 = vrot.lane.b32.xlu0 %v2005_v26, %s1766_s25  ;;  %v1657_v45 = vpack.i.bf16 %v2003_v25, %v2005_v26 }
 0x5dd   :  { %v512_v27 = vpop.permute.xlu1 %511 }
 0x5de   :  { %v509_v28 = vpop.permute.xlu0 %508  ;;  %v513_v29 = vsel %vm45_vm0, %v512_v27, %v1985_v1 }
 0x5df   :  { %534 = vrot.lane.b32.xlu1 %v513_v29, %s1766_s25  ;;  %v510_v30 = vsel %vm45_vm0, %v509_v28, %v1987_v2 }
 0x5e0   :  { %532 = vrot.lane.b32.xlu0 %v510_v30, %s1766_s25 }
 0x5e1   :  { %v518_v31 = vpop.permute.xlu1 %517 }
 0x5e2   :  { %v515_v32 = vpop.permute.xlu0 %514  ;;  %v519_v33 = vsel %vm45_vm0, %v518_v31, %v503_v11  ;;  %v621_v31 = vld [vmem:[%s2374_s6 + $0x8] sm:$0xff] }
 0x5e3   :  { %538 = vrot.lane.b32.xlu1 %v519_v33, %s1766_s25  ;;  %v516_v34 = vsel %vm45_vm0, %v515_v32, %v1993_v12  ;;  %1301 = vmatprep.mubr.msk.f32.mxu0 %vm828_vm6, %v621_v31 }
 0x5e4   :  { %536 = vrot.lane.b32.xlu0 %v516_v34, %s1766_s25 }
 0x5e5   :  { %v524_v35 = vpop.permute.xlu1 %523 }
 0x5e6   :  { %v521_v36 = vpop.permute.xlu0 %520  ;;  %v525_v37 = vsel %vm45_vm0, %v524_v35, %v505_v17 }
 0x5e7   :  { %542 = vrot.lane.b32.xlu1 %v525_v37, %s1766_s25  ;;  %v522_v38 = vsel %vm45_vm0, %v521_v36, %v1998_v19  ;;  %v652_v37 = vld [vmem:[%s2375_s7] sm:$0xff] }
 0x5e8   :  { %540 = vrot.lane.b32.xlu0 %v522_v38, %s1766_s25 }
 0x5e9   :  { %v530_v39 = vpop.permute.xlu1 %529 }
 0x5ea   :  { %v527_v40 = vpop.permute.xlu0 %526  ;;  %v531_v41 = vsel %vm45_vm0, %v530_v39, %v2003_v25 }
 0x5eb   :  { %546 = vrot.lane.b32.xlu1 %v531_v41, %s1766_s25  ;;  %v528_v42 = vsel %vm45_vm0, %v527_v40, %v2005_v26 }
 0x5ec   :  { %544 = vrot.lane.b32.xlu0 %v528_v42, %s1766_s25  ;;  %v653_v42 = vld [vmem:[%s2375_s7 + $0x8] sm:$0xff] }
 0x5ef   :  { %1648 = vrot.lane.b32.xlu1 %v1647_v43, %s1768_s29 }
 0x5f0   :  { %1643 = vrot.lane.b32.xlu0 %v1642_v44, %s1768_s29 }
 0x5f3   :  { %1658 = vrot.lane.b32.xlu1 %v1657_v45, %s1768_s29 }
 0x5f4   :  { %1653 = vrot.lane.b32.xlu0 %v1652_v46, %s1768_s29  ;;  %v654_v46 = vld [vmem:[%s2375_s7 + $0x10] sm:$0xff] }
 0x651   :  { %v535_v47 = vpop.permute.xlu1 %534 }
 0x652   :  { %v549_v48 = vsel %vm45_vm0, %v535_v47, %v1985_v1  ;;  %v533_v49 = vpop.permute.xlu0 %532 }
 0x653   :  { %v565_v50 = vmul.f32 %v549_v48, %v1856_v7  ;;  %v548_v51 = vsel %vm45_vm0, %v533_v49, %v1987_v2  ;;  %v557_v5 = vmul.f32 %v549_v48, %v1861_v10  ;;  %v655_v48 = vld [vmem:[%s2375_s7 + $0x18] sm:$0xff] }
 0x654   :  { %v564_v52 = vmul.f32 %v548_v51, %v1856_v7  ;;  %v556_v6 = vmul.f32 %v548_v51, %v1861_v10 }
 0x655   :  { %v539_v53 = vpop.permute.xlu1 %538 }
 0x656   :  { %v551_v54 = vsel %vm45_vm0, %v539_v53, %v503_v11  ;;  %v537_v55 = vpop.permute.xlu0 %536  ;;  %v1662_v56 = vpack.i.bf16 %v565_v50, %v564_v52  ;;  %v1682_v20 = vpack.i.bf16 %v557_v5, %v556_v6  ;;  %v656_v52 = vld [vmem:[%s2375_s7 + $0x20] sm:$0xff] }
 0x657   :  { %v567_v57 = vmul.f32 %v551_v54, %v1856_v7  ;;  %v550_v58 = vsel %vm45_vm0, %v537_v55, %v1993_v12  ;;  %v559_v15 = vmul.f32 %v551_v54, %v1861_v10  ;;  %v657_v54 = vld [vmem:[%s2375_s7 + $0x28] sm:$0xff] }
 0x658   :  { %v566_v59 = vmul.f32 %v550_v58, %v1856_v7  ;;  %1663 = vrot.lane.b32.xlu0 %v1662_v56, %s1769_s0  ;;  %v558_v16 = vmul.f32 %v550_v58, %v1861_v10  ;;  %v658_v58 = vld [vmem:[%s2375_s7 + $0x30] sm:$0xff] }
 0x659   :  { %v543_v60 = vpop.permute.xlu1 %542 }
 0x65a   :  { %v553_v61 = vsel %vm45_vm0, %v543_v60, %v505_v17  ;;  %v541_v62 = vpop.permute.xlu0 %540  ;;  %v1667_v63 = vpack.i.bf16 %v567_v57, %v566_v59  ;;  %v659_v60 = vld [vmem:[%s2375_s7 + $0x38] sm:$0xff] }
 0x65b   :  { %v569_v1 = vmul.f32 %v553_v61, %v1856_v7  ;;  %v552_v2 = vsel %vm45_vm0, %v541_v62, %v1998_v19  ;;  %v561_v17 = vmul.f32 %v553_v61, %v1861_v10 }
 0x65c   :  { %v568_v3 = vmul.f32 %v552_v2, %v1856_v7  ;;  %1668 = vrot.lane.b32.xlu1 %v1667_v63, %s1769_s0  ;;  %v560_v18 = vmul.f32 %v552_v2, %v1861_v10 }
 0x65d   :  { %v547_v4 = vpop.permute.xlu1 %546 }
 0x65e   :  { %v555_v8 = vsel %vm45_vm0, %v547_v4, %v2003_v25  ;;  %v545_v9 = vpop.permute.xlu0 %544  ;;  %v1672_v11 = vpack.i.bf16 %v569_v1, %v568_v3  ;;  %v1692_v23 = vpack.i.bf16 %v561_v17, %v560_v18  ;;  %v660_v1 = vld [vmem:[%s2375_s7 + $0x40] sm:$0xff]  ;;  %v661_v3 = vld [vmem:[%s2375_s7 + $0x48] sm:$0xff]  ;;  %v666_v18 = vld [vmem:[%s2375_s7 + $0x70] sm:$0xff] }
 0x65f   :  { %v571_v12 = vmul.f32 %v555_v8, %v1856_v7  ;;  %v554_v13 = vsel %vm45_vm0, %v545_v9, %v2005_v26  ;;  %v563_v24 = vmul.f32 %v555_v8, %v1861_v10  ;;  %v662_v8 = vld [vmem:[%s2375_s7 + $0x50] sm:$0xff] }
 0x660   :  { %v570_v14 = vmul.f32 %v554_v13, %v1856_v7  ;;  %1673 = vrot.lane.b32.xlu0 %v1672_v11, %s1769_s0  ;;  %v1687_v7 = vpack.i.bf16 %v559_v15, %v558_v16  ;;  %v562_v25 = vmul.f32 %v554_v13, %v1861_v10  ;;  %v663_v11 = vld [vmem:[%s2375_s7 + $0x58] sm:$0xff]  ;;  %v664_v15 = vld [vmem:[%s2375_s7 + $0x60] sm:$0xff]  ;;  %v665_v16 = vld [vmem:[%s2375_s7 + $0x68] sm:$0xff] }
 0x661   :  { %v1649_v22 = vpop.permute.xlu1 %1648 }
 0x662   :  { %v1644_v19 = vpop.permute.xlu0 %1643  ;;  %v1677_v21 = vpack.i.bf16 %v571_v12, %v570_v14  ;;  %v1697_v27 = vpack.i.bf16 %v563_v24, %v562_v25 }
 0x664   :  { %1683 = vrot.lane.b32.xlu0 %v1682_v20, %s1770_s15  ;;  %1678 = vrot.lane.b32.xlu1 %v1677_v21, %s1769_s0 }
 0x665   :  { %v1659_v28 = vpop.permute.xlu1 %1658 }
 0x666   :  { %v1654_v26 = vpop.permute.xlu0 %1653 }
 0x668   :  { %1693 = vrot.lane.b32.xlu0 %v1692_v23, %s1770_s15  ;;  %1688 = vrot.lane.b32.xlu1 %v1687_v7, %s1770_s15 }
 0x66c   :  { %1698 = vrot.lane.b32.xlu1 %v1697_v27, %s1770_s15  ;;  %1703 = vrot.lane.b32.xlu0 %v1644_v19, %s1770_s15  ;;  %v667_v19 = vld [vmem:[%s2375_s7 + $0x78] sm:$0xff] }
 0x670   :  { %1708 = vrot.lane.b32.xlu1 %v1649_v22, %s1770_s15  ;;  %1713 = vrot.lane.b32.xlu0 %v1654_v26, %s1770_s15 }
 0x674   :  { %1718 = vrot.lane.b32.xlu1 %v1659_v28, %s1770_s15 }
 0x6ca   :  { %v1664_v29 = vpop.permute.xlu0 %1663 }
 0x6cb   :  { %1723 = vrot.lane.b32.xlu0 %v1664_v29, %s1770_s15 }
 0x6ce   :  { %v1669_v30 = vpop.permute.xlu1 %1668 }
 0x6cf   :  { %1728 = vrot.lane.b32.xlu1 %v1669_v30, %s1770_s15 }
 0x6d2   :  { %v1674_v10 = vpop.permute.xlu0 %1673 }
 0x6d3   :  { %1733 = vrot.lane.b32.xlu0 %v1674_v10, %s1770_s15 }
 0x6d6   :  { %v1679_v32 = vpop.permute.xlu1 %1678  ;;  %v1684_v33 = vpop.permute.xlu0 %1683 }
 0x6d7   :  { %v1686_v34 = vunpack.i.h.bf16 %v1684_v33  ;;  %v1685_v35 = vunpack.i.l.bf16 %v1684_v33  ;;  %1738 = vrot.lane.b32.xlu1 %v1679_v32, %s1770_s15  ;;  %670 = vperm.xlu0 %1591, %v652_v37   ;;  %v625_v37 = vld [vmem:[%s2374_s6 + $0x28] sm:$0xff] }
 0x6d9   :  { %v1503_v36 = vpack.c.bf16 %v1686_v34, %v1685_v35  ;;  %v620_v34 = vld [vmem:[%s2374_s6] sm:$0xff]  ;;  %v623_v35 = vld [vmem:[%s2374_s6 + $0x18] sm:$0xff] }
 0x6da   :  { %v1689_v38 = vpop.permute.xlu1 %1688  ;;  %v1694_v39 = vpop.permute.xlu0 %1693 }
 0x6db   :  { %v1691_v40 = vunpack.i.h.bf16 %v1689_v38  ;;  %v1690_v41 = vunpack.i.l.bf16 %v1689_v38  ;;  %1504 = vmatpush1.bf16.msra.mxu0 %v1503_v36  ;;  %v1696_v44 = vunpack.i.h.bf16 %v1694_v39  ;;  %v1695_v45 = vunpack.i.l.bf16 %v1694_v39  ;;  %675 = vperm.xlu1 %1590, %v653_v42   ;;  %v622_v36 = vld [vmem:[%s2374_s6 + $0x10] sm:$0xff]  ;;  %v624_v38 = vld [vmem:[%s2374_s6 + $0x20] sm:$0xff]  ;;  %v627_v39 = vld [vmem:[%s2374_s6 + $0x38] sm:$0xff] }
 0x6dc   :  { %1505 = vmatprep.subr.bf16.mxu0 %v1773_v0  ;;  %680 = vperm.xlu0 %1591, %v654_v46   ;;  %v628_v42 = vld [vmem:[%s2374_s6 + $0x40] sm:$0xff] }
 0x6dd   :  { %v1506_v43 = vpack.c.bf16 %v1691_v40, %v1690_v41  ;;  %v1509_v49 = vpack.c.bf16 %v1696_v44, %v1695_v45  ;;  %v626_v40 = vld [vmem:[%s2374_s6 + $0x30] sm:$0xff]  ;;  %v629_v41 = vld [vmem:[%s2374_s6 + $0x48] sm:$0xff]  ;;  %v632_v46 = vld [vmem:[%s2374_s6 + $0x60] sm:$0xff] }
 0x6de   :  { %v1699_v47 = vpop.permute.xlu1 %1698  ;;  %v1704_v53 = vpop.permute.xlu0 %1703  ;;  %v630_v44 = vld [vmem:[%s2374_s6 + $0x50] sm:$0xff]  ;;  %v633_v45 = vld [vmem:[%s2374_s6 + $0x68] sm:$0xff] }
 0x6df   :  { %1507 = vmatpush1.bf16.msra.mxu0 %v1506_v43  ;;  %v1701_v50 = vunpack.i.h.bf16 %v1699_v47  ;;  %v1700_v51 = vunpack.i.l.bf16 %v1699_v47  ;;  %685 = vperm.xlu1 %1590, %v655_v48   ;;  %v1706_v56 = vunpack.i.h.bf16 %v1704_v53  ;;  %v1705_v57 = vunpack.i.l.bf16 %v1704_v53  ;;  %v631_v43 = vld [vmem:[%s2374_s6 + $0x58] sm:$0xff]  ;;  %v634_v48 = vld [vmem:[%s2374_s6 + $0x70] sm:$0xff]  ;;  %v641_v53 = vld [vmem:[%s2374_s6 + $0xa8] sm:$0xff] }
 0x6e0   :  { %1508 = vmatprep.subr.bf16.mxu0 %v1773_v0  ;;  %690 = vperm.xlu0 %1591, %v656_v52   ;;  %v635_v47 = vld [vmem:[%s2374_s6 + $0x78] sm:$0xff]  ;;  %v638_v52 = vld [vmem:[%s2374_s6 + $0x90] sm:$0xff] }
 0x6e1   :  { %v1512_v55 = vpack.c.bf16 %v1701_v50, %v1700_v51  ;;  %v1515_v61 = vpack.c.bf16 %v1706_v56, %v1705_v57  ;;  %v636_v50 = vld [vmem:[%s2374_s6 + $0x80] sm:$0xff]  ;;  %v639_v51 = vld [vmem:[%s2374_s6 + $0x98] sm:$0xff]  ;;  %v642_v56 = vld [vmem:[%s2374_s6 + $0xb0] sm:$0xff] }
 0x6e2   :  { %v1709_v59 = vpop.permute.xlu1 %1708  ;;  %v1714_v2 = vpop.permute.xlu0 %1713  ;;  %v645_v57 = vld [vmem:[%s2374_s6 + $0xc8] sm:$0xff] }
 0x6e3   :  { %1510 = vmatpush1.bf16.msra.mxu0 %v1509_v49  ;;  %695 = vperm.xlu1 %1590, %v657_v54   ;;  %v1711_v62 = vunpack.i.h.bf16 %v1709_v59  ;;  %v1710_v63 = vunpack.i.l.bf16 %v1709_v59  ;;  %v1716_v5 = vunpack.i.h.bf16 %v1714_v2  ;;  %v1715_v6 = vunpack.i.l.bf16 %v1714_v2  ;;  %v637_v49 = vld [vmem:[%s2374_s6 + $0x88] sm:$0xff]  ;;  %v640_v54 = vld [vmem:[%s2374_s6 + $0xa0] sm:$0xff]  ;;  %v647_v59 = vld [vmem:[%s2374_s6 + $0xd8] sm:$0xff] }
 0x6e4   :  { %1511 = vmatprep.subr.bf16.mxu0 %v1773_v0  ;;  %700 = vperm.xlu0 %1591, %v658_v58   ;;  %v644_v58 = vld [vmem:[%s2374_s6 + $0xc0] sm:$0xff] }
 0x6e5   :  { %v1518_v4 = vpack.c.bf16 %v1711_v62, %v1710_v63  ;;  %v1521_v12 = vpack.c.bf16 %v1716_v5, %v1715_v6  ;;  %v648_v62 = vld [vmem:[%s2374_s6 + $0xe0] sm:$0xff]  ;;  %v651_v63 = vld [vmem:[%s2374_s6 + $0xf8] sm:$0xff] }
 0x6e6   :  { %v1719_v9 = vpop.permute.xlu1 %1718  ;;  %v1084_v2 = vld [vmem:[%s2376_s8] sm:$0xff] }
 0x6e7   :  { %1513 = vmatpush1.bf16.msra.mxu0 %v1512_v55  ;;  %705 = vperm.xlu1 %1590, %v659_v60   ;;  %v1721_v13 = vunpack.i.h.bf16 %v1719_v9  ;;  %v1720_v14 = vunpack.i.l.bf16 %v1719_v9  ;;  %v643_v55 = vld [vmem:[%s2374_s6 + $0xb8] sm:$0xff]  ;;  %v646_v60 = vld [vmem:[%s2374_s6 + $0xd0] sm:$0xff] }
 0x6e8   :  { %1514 = vmatprep.subr.bf16.mxu0 %v1773_v0  ;;  %710 = vperm.xlu0 %1591, %v660_v1   ;;  %v650_v1 = vld [vmem:[%s2374_s6 + $0xf0] sm:$0xff] }
 0x6e9   :  { %v1524_v17 = vpack.c.bf16 %v1721_v13, %v1720_v14  ;;  %v1086_v14 = vld [vmem:[%s2376_s8 + $0x10] sm:$0xff] }
 0x6eb   :  { %1516 = vmatpush1.bf16.msra.mxu0 %v1515_v61  ;;  %715 = vperm.xlu1 %1590, %v661_v3   ;;  %v649_v61 = vld [vmem:[%s2374_s6 + $0xe8] sm:$0xff] }
 0x6ec   :  { %1517 = vmatprep.subr.bf16.mxu0 %v1773_v0  ;;  %720 = vperm.xlu0 %1591, %v662_v8   ;;  %v1085_v3 = vld [vmem:[%s2376_s8 + $0x8] sm:$0xff] }
 0x6ef   :  { %1519 = vmatpush1.bf16.msra.mxu0 %v1518_v4  ;;  %725 = vperm.xlu1 %1590, %v663_v11   ;;  %v1539_v4 = vpack.c.bf16 %v1085_v3, %v1084_v2  ;;  %v1775_v3 = vmov 0.0  }
 0x6f0   :  { %1520 = vmatprep.subr.bf16.mxu0 %v1773_v0  ;;  %730 = vperm.xlu0 %1591, %v664_v15   ;;  %v1087_v15 = vld [vmem:[%s2376_s8 + $0x18] sm:$0xff] }
 0x6f1   :  { %1540 = vmatpush3.bf16.msra.mxu1 %v1539_v4  ;;  %1450 = vmatprep.mubr.msk.f32.mxu1 %vm1774_vm7, %v1775_v3 }
 0x6f2   :  { %1541 = vmatprep.subr.bf16.mxu1 %v1773_v0 }
 0x6f3   :  { %1522 = vmatpush1.bf16.msra.mxu0 %v1521_v12  ;;  %735 = vperm.xlu1 %1590, %v665_v16  }
 0x6f4   :  { %1523 = vmatprep.subr.bf16.mxu0 %v1773_v0  ;;  %740 = vperm.xlu0 %1591, %v666_v18   ;;  %v1542_v18 = vpack.c.bf16 %v1087_v15, %v1086_v14 }
 0x6f6   :  { %1543 = vmatpush3.bf16.msra.mxu1 %v1542_v18 }
 0x6f7   :  { %1525 = vmatpush1.bf16.msra.mxu0 %v1524_v17  ;;  %745 = vperm.xlu1 %1590, %v667_v19  }
 0x6f8   :  { %1526 = vmatprep.subr.bf16.mxu0 %v1773_v0  ;;  %1544 = vmatprep.subr.bf16.mxu1 %v1773_v0 }
 0x73d   :  { %v1724_v20 = vpop.permute.xlu0 %1723 }
 0x73e   :  { %v1726_v21 = vunpack.i.h.bf16 %v1724_v20  ;;  %v1725_v22 = vunpack.i.l.bf16 %v1724_v20 }
 0x740   :  { %v1527_v23 = vpack.c.bf16 %v1726_v21, %v1725_v22  ;;  %v1088_v22 = vld [vmem:[%s2376_s8 + $0x20] sm:$0xff] }
 0x741   :  { %v1729_v7 = vpop.permute.xlu1 %1728 }
 0x742   :  { %v1731_v24 = vunpack.i.h.bf16 %v1729_v7  ;;  %v1730_v25 = vunpack.i.l.bf16 %v1729_v7  ;;  %1528 = vmatpush1.bf16.msra.mxu0 %v1527_v23  ;;  %v1089_v23 = vld [vmem:[%s2376_s8 + $0x28] sm:$0xff] }
 0x743   :  { %1529 = vmatprep.subr.bf16.mxu0 %v1773_v0 }
 0x744   :  { %v1530_v26 = vpack.c.bf16 %v1731_v24, %v1730_v25  ;;  %v1545_v25 = vpack.c.bf16 %v1089_v23, %v1088_v22 }
 0x745   :  { %v1734_v27 = vpop.permute.xlu0 %1733 }
 0x746   :  { %v1736_v28 = vunpack.i.h.bf16 %v1734_v27  ;;  %v1735_v29 = vunpack.i.l.bf16 %v1734_v27  ;;  %1531 = vmatpush1.bf16.msra.mxu0 %v1530_v26  ;;  %1546 = vmatpush3.bf16.msra.mxu1 %v1545_v25 }
 0x747   :  { %1532 = vmatprep.subr.bf16.mxu0 %v1773_v0  ;;  %1547 = vmatprep.subr.bf16.mxu1 %v1773_v0 }
 0x748   :  { %v1533_v30 = vpack.c.bf16 %v1736_v28, %v1735_v29  ;;  %v1090_v29 = vld [vmem:[%s2376_s8 + $0x30] sm:$0xff] }
 0x749   :  { %v1739_v10 = vpop.permute.xlu1 %1738 }
 0x74a   :  { %v1741_v31 = vunpack.i.h.bf16 %v1739_v10  ;;  %v1740_v32 = vunpack.i.l.bf16 %v1739_v10  ;;  %1534 = vmatpush1.bf16.msra.mxu0 %v1533_v30  ;;  %v1091_v30 = vld [vmem:[%s2376_s8 + $0x38] sm:$0xff] }
 0x74b   :  { %1535 = vmatprep.subr.bf16.mxu0 %v1773_v0 }
 0x74c   :  { %v1536_v33 = vpack.c.bf16 %v1741_v31, %v1740_v32  ;;  %v1548_v32 = vpack.c.bf16 %v1091_v30, %v1090_v29 }
 0x74e   :  { %1537 = vmatpush1.bf16.msra.mxu0 %v1536_v33  ;;  %1549 = vmatpush3.bf16.msra.mxu1 %v1548_v32 }
 0x74f   :  { %1550 = vmatprep.subr.bf16.mxu1 %v1773_v0 }
 0x751   :  { %942 = vmatmul.mubr.f32.vlgmr.msra.gmra.mrb[0].mxu0 %v620_v34 }
 0x752   :  { %1302 = vmatprep.mubr.msk.f32.mxu0 %vm828_vm6, %v623_v35 }
 0x755   :  { %947 = vmatmul.mubr.f32.gmra.mrb[2].mxu0 %v622_v36  ;;  %v1092_v36 = vld [vmem:[%s2376_s8 + $0x40] sm:$0xff] }
 0x756   :  { %1303 = vmatprep.mubr.msk.f32.mxu0 %vm828_vm6, %v625_v37  ;;  %v671_v5 = vpop.permute.xlu0 %670  ;;  %v1093_v37 = vld [vmem:[%s2376_s8 + $0x48] sm:$0xff] }
 0x759   :  { %952 = vmatmul.mubr.f32.gmra.mrb[4].mxu0 %v624_v38 }
 0x75a   :  { %1304 = vmatprep.mubr.msk.f32.mxu0 %vm828_vm6, %v627_v39  ;;  %v676_v12 = vpop.permute.xlu1 %675 }
 0x75b   :  { %v681_v20 = vpop.permute.xlu0 %680 }
 0x75d   :  { %957 = vmatmul.mubr.f32.gmra.mrb[6].mxu0 %v626_v40  ;;  %v1551_v40 = vpack.c.bf16 %v1093_v37, %v1092_v36 }
 0x75e   :  { %1305 = vmatprep.mubr.msk.f32.mxu0 %vm828_vm6, %v629_v41  ;;  %v686_v27 = vpop.permute.xlu1 %685 }
 0x75f   :  { %v691_v34 = vpop.permute.xlu0 %690  ;;  %1552 = vmatpush3.bf16.msra.mxu1 %v1551_v40 }
 0x760   :  { %1553 = vmatprep.subr.bf16.mxu1 %v1773_v0 }
 0x761   :  { %962 = vmatmul.mubr.f32.gmra.mrb[8].mxu0 %v628_v42 }
 0x762   :  { %1306 = vmatprep.mubr.msk.f32.mxu0 %vm828_vm6, %v631_v43  ;;  %v696_v42 = vpop.permute.xlu1 %695 }
 0x765   :  { %967 = vmatmul.mubr.f32.gmra.mrb[10].mxu0 %v630_v44  ;;  %v1094_v44 = vld [vmem:[%s2376_s8 + $0x50] sm:$0xff] }
 0x766   :  { %1307 = vmatprep.mubr.msk.f32.mxu0 %vm828_vm6, %v633_v45  ;;  %v1095_v45 = vld [vmem:[%s2376_s8 + $0x58] sm:$0xff] }
 0x769   :  { %972 = vmatmul.mubr.f32.gmra.mrb[12].mxu0 %v632_v46 }
 0x76a   :  { %1308 = vmatprep.mubr.msk.f32.mxu0 %vm828_vm6, %v635_v47 }
 0x76d   :  { %977 = vmatmul.mubr.f32.gmra.mrb[14].mxu0 %v634_v48  ;;  %v1554_v48 = vpack.c.bf16 %v1095_v45, %v1094_v44 }
 0x76e   :  { %1309 = vmatprep.mubr.msk.f32.mxu0 %vm828_vm6, %v637_v49 }
 0x76f   :  { %1555 = vmatpush3.bf16.msra.mxu1 %v1554_v48 }
 0x770   :  { %1556 = vmatprep.subr.bf16.mxu1 %v1773_v0 }
 0x771   :  { %982 = vmatmul.mubr.f32.gmra.mrb[16].mxu0 %v636_v50  ;;  %v701_v50 = vpop.permute.xlu0 %700 }
 0x772   :  { %1310 = vmatprep.mubr.msk.f32.mxu0 %vm828_vm6, %v639_v51 }
 0x775   :  { %987 = vmatmul.mubr.f32.gmra.mrb[18].mxu0 %v638_v52  ;;  %v1096_v52 = vld [vmem:[%s2376_s8 + $0x60] sm:$0xff]  ;;  %v711_v4 = vpop.permute.xlu0 %710 }
 0x776   :  { %1311 = vmatprep.mubr.msk.f32.mxu0 %vm828_vm6, %v641_v53  ;;  %v1097_v53 = vld [vmem:[%s2376_s8 + $0x68] sm:$0xff] }
 0x779   :  { %992 = vmatmul.mubr.f32.gmra.mrb[20].mxu0 %v640_v54 }
 0x77a   :  { %1312 = vmatprep.mubr.msk.f32.mxu0 %vm828_vm6, %v643_v55 }
 0x77d   :  { %997 = vmatmul.mubr.f32.gmra.mrb[22].mxu0 %v642_v56  ;;  %v1557_v56 = vpack.c.bf16 %v1097_v53, %v1096_v52 }
 0x77e   :  { %1313 = vmatprep.mubr.msk.f32.mxu0 %vm828_vm6, %v645_v57 }
 0x77f   :  { %1558 = vmatpush3.bf16.msra.mxu1 %v1557_v56 }
 0x780   :  { %1559 = vmatprep.subr.bf16.mxu1 %v1773_v0 }
 0x781   :  { %1002 = vmatmul.mubr.f32.gmra.mrb[24].mxu0 %v644_v58  ;;  %v706_v58 = vpop.permute.xlu1 %705 }
 0x782   :  { %1314 = vmatprep.mubr.msk.f32.mxu0 %vm828_vm6, %v647_v59 }
 0x785   :  { %1007 = vmatmul.mubr.f32.gmra.mrb[26].mxu0 %v646_v60  ;;  %v1098_v60 = vld [vmem:[%s2376_s8 + $0x70] sm:$0xff] }
 0x786   :  { %1315 = vmatprep.mubr.msk.f32.mxu0 %vm828_vm6, %v649_v61  ;;  %v1099_v61 = vld [vmem:[%s2376_s8 + $0x78] sm:$0xff] }
 0x789   :  { %1012 = vmatmul.mubr.f32.gmra.mrb[28].mxu0 %v648_v62 }
 0x78a   :  { %1316 = vmatprep.mubr.msk.f32.mxu0 %vm828_vm6, %v651_v63 }
 0x78d   :  { %1017 = vmatmul.mubr.f32.gmra.mrb[30].mxu0 %v650_v1  ;;  %v1560_v1 = vpack.c.bf16 %v1099_v61, %v1098_v60  ;;  %v1184_v60 = vld [vmem:[%s2378_s10 + $0x8] sm:$0xff] }
 0x78f   :  { %1561 = vmatpush3.bf16.msra.mxu1 %v1560_v1 }
 0x790   :  { %1562 = vmatprep.subr.bf16.mxu1 %v1773_v0 }
 0x824   :  { %v943_v6 = vpop.f32.mrb[0].mxu0 }
 0x825   :  { %v944_v8 = vadd.f32 %v943_v6, %v671_v5  ;;  %v945_v9 = vpop.f32.mrb[1].mxu0 }
 0x827   :  { %v1022_v11 = vmax.f32 %v944_v8, 0.0 }
 0x828   :  { %v948_v13 = vpop.f32.mrb[2].mxu0 }
 0x829   :  { %v949_v16 = vadd.f32 %v948_v13, %v676_v12  ;;  %v950_v17 = vpop.f32.mrb[3].mxu0  ;;  %1038 = vxpose.xlu0.b32.start [1/16] (narrow) %v1022_v11, 32  ;;  %v716_v11 = vpop.permute.xlu1 %715 }
 0x82b   :  { %v1023_v19 = vmax.f32 %v949_v16, 0.0  ;;  %v721_v16 = vpop.permute.xlu0 %720 }
 0x82c   :  { %v953_v21 = vpop.f32.mrb[4].mxu0 }
 0x82d   :  { %v954_v7 = vadd.f32 %v953_v21, %v681_v20  ;;  %v955_v24 = vpop.f32.mrb[5].mxu0  ;;  %1039 = vxpose.xlu0.b32.cont [2/16] (narrow) %v1023_v19, 32  ;;  %v726_v21 = vpop.permute.xlu1 %725 }
 0x82f   :  { %v1024_v26 = vmax.f32 %v954_v7, 0.0  ;;  %v731_v25 = vpop.permute.xlu0 %730 }
 0x830   :  { %v958_v28 = vpop.f32.mrb[6].mxu0 }
 0x831   :  { %v959_v10 = vadd.f32 %v958_v28, %v686_v27  ;;  %v960_v31 = vpop.f32.mrb[7].mxu0  ;;  %1040 = vxpose.xlu0.b32.cont [3/16] (narrow) %v1024_v26, 32  ;;  %v736_v30 = vpop.permute.xlu1 %735 }
 0x833   :  { %v1025_v33 = vmax.f32 %v959_v10, 0.0 }
 0x834   :  { %v963_v35 = vpop.f32.mrb[8].mxu0 }
 0x835   :  { %v964_v38 = vadd.f32 %v963_v35, %v691_v34  ;;  %v965_v39 = vpop.f32.mrb[9].mxu0  ;;  %1041 = vxpose.xlu0.b32.cont [4/16] (narrow) %v1025_v33, 32  ;;  %v741_v34 = vpop.permute.xlu0 %740 }
 0x836   :  { %v746_v39 = vpop.permute.xlu1 %745 }
 0x837   :  { %v1026_v41 = vmax.f32 %v964_v38, 0.0 }
 0x838   :  { %v968_v43 = vpop.f32.mrb[10].mxu0 }
 0x839   :  { %v969_v46 = vadd.f32 %v968_v43, %v696_v42  ;;  %v970_v47 = vpop.f32.mrb[11].mxu0  ;;  %1042 = vxpose.xlu0.b32.cont [5/16] (narrow) %v1026_v41, 32 }
 0x83b   :  { %v1027_v49 = vmax.f32 %v969_v46, 0.0 }
 0x83c   :  { %v973_v51 = vpop.f32.mrb[12].mxu0 }
 0x83d   :  { %v974_v54 = vadd.f32 %v973_v51, %v701_v50  ;;  %v975_v55 = vpop.f32.mrb[13].mxu0  ;;  %1043 = vxpose.xlu0.b32.cont [6/16] (narrow) %v1027_v49, 32 }
 0x83f   :  { %v1028_v57 = vmax.f32 %v974_v54, 0.0 }
 0x840   :  { %v978_v59 = vpop.f32.mrb[14].mxu0 }
 0x841   :  { %v979_v62 = vadd.f32 %v978_v59, %v706_v58  ;;  %v980_v63 = vpop.f32.mrb[15].mxu0  ;;  %1044 = vxpose.xlu0.b32.cont [7/16] (narrow) %v1028_v57, 32  ;;  %v1183_v59 = vld [vmem:[%s2378_s10] sm:$0xff] }
 0x842   :  { %v1563_v1 = vpack.c.bf16 %v1184_v60, %v1183_v59 }
 0x843   :  { %v1029_v2 = vmax.f32 %v979_v62, 0.0 }
 0x844   :  { %v983_v5 = vpop.f32.mrb[16].mxu0 }
 0x845   :  { %v984_v6 = vadd.f32 %v983_v5, %v711_v4  ;;  %v985_v8 = vpop.f32.mrb[17].mxu0  ;;  %1045 = vxpose.xlu0.b32.cont [8/16] (narrow) %v1029_v2, 32  ;;  %v1185_v2 = vld [vmem:[%s2378_s10 + $0x10] sm:$0xff]  ;;  %v1186_v4 = vld [vmem:[%s2378_s10 + $0x18] sm:$0xff] }
 0x846   :  { %v1187_v8 = vld [vmem:[%s2378_s10 + $0x20] sm:$0xff] }
 0x847   :  { %v1030_v9 = vmax.f32 %v984_v6, 0.0  ;;  %v1566_v6 = vpack.c.bf16 %v1186_v4, %v1185_v2 }
 0x848   :  { %v988_v12 = vpop.f32.mrb[18].mxu0 }
 0x849   :  { %v989_v13 = vadd.f32 %v988_v12, %v716_v11  ;;  %v990_v14 = vpop.f32.mrb[19].mxu0  ;;  %1046 = vxpose.xlu0.b32.cont [9/16] (narrow) %v1030_v9, 32  ;;  %v1188_v9 = vld [vmem:[%s2378_s10 + $0x28] sm:$0xff]  ;;  %v1190_v12 = vld [vmem:[%s2378_s10 + $0x38] sm:$0xff] }
 0x84a   :  { %v1569_v11 = vpack.c.bf16 %v1188_v9, %v1187_v8  ;;  %v1317_v14 = vld [vmem:[%s2377_s9] ss:$0 sm:$0xff] }
 0x84b   :  { %v1031_v15 = vmax.f32 %v989_v13, 0.0 }
 0x84c   :  { %v993_v17 = vpop.f32.mrb[20].mxu0 }
 0x84d   :  { %v994_v18 = vadd.f32 %v993_v17, %v721_v16  ;;  %v995_v19 = vpop.f32.mrb[21].mxu0  ;;  %1047 = vxpose.xlu0.b32.cont [10/16] (narrow) %v1031_v15, 32 }
 0x84f   :  { %v1032_v20 = vmax.f32 %v994_v18, 0.0 }
 0x850   :  { %v998_v22 = vpop.f32.mrb[22].mxu0 }
 0x851   :  { %v999_v23 = vadd.f32 %v998_v22, %v726_v21  ;;  %v1000_v7 = vpop.f32.mrb[23].mxu0  ;;  %1048 = vxpose.xlu0.b32.cont [11/16] (narrow) %v1032_v20, 32 }
 0x853   :  { %v1033_v24 = vmax.f32 %v999_v23, 0.0 }
 0x854   :  { %v1003_v26 = vpop.f32.mrb[24].mxu0 }
 0x855   :  { %v1004_v27 = vadd.f32 %v1003_v26, %v731_v25  ;;  %v1005_v28 = vpop.f32.mrb[25].mxu0  ;;  %1049 = vxpose.xlu0.b32.cont [12/16] (narrow) %v1033_v24, 32 }
 0x857   :  { %v1034_v29 = vmax.f32 %v1004_v27, 0.0 }
 0x858   :  { %v1008_v10 = vpop.f32.mrb[26].mxu0 }
 0x859   :  { %v1009_v31 = vadd.f32 %v1008_v10, %v736_v30  ;;  %v1010_v32 = vpop.f32.mrb[27].mxu0  ;;  %1050 = vxpose.xlu0.b32.cont [13/16] (narrow) %v1034_v29, 32 }
 0x85b   :  { %v1035_v33 = vmax.f32 %v1009_v31, 0.0 }
 0x85c   :  { %v1013_v35 = vpop.f32.mrb[28].mxu0 }
 0x85d   :  { %v1014_v36 = vadd.f32 %v1013_v35, %v741_v34  ;;  %v1015_v37 = vpop.f32.mrb[29].mxu0  ;;  %1051 = vxpose.xlu0.b32.cont [14/16] (narrow) %v1035_v33, 32 }
 0x85f   :  { %v1036_v38 = vmax.f32 %v1014_v36, 0.0 }
 0x860   :  { %v1018_v40 = vpop.f32.mrb[30].mxu0 }
 0x861   :  { %v1019_v41 = vadd.f32 %v1018_v40, %v746_v39  ;;  %v1020_v42 = vpop.f32.mrb[31].mxu0  ;;  %1052 = vxpose.xlu0.b32.cont [15/16] (narrow) %v1036_v38, 32 }
 0x863   :  { %v1037_v43 = vmax.f32 %v1019_v41, 0.0 }
 0x865   :  { %1053 = vxpose.xlu0.b32.end [16/16] (narrow) %v1037_v43, 32 }
 0x8a9   :  { %v1054_v44 = vpop.trf.xlu0 }
 0x8ad   :  { %v1055_v45 = vpop.trf.xlu0 }
 0x8ae   :  { %v1070_v46 = vadd.f32 %v1055_v45, %v1054_v44 }
 0x8b0   :  { %v1071_v47 = vrot.slane %v1070_v46, 4 }
 0x8b1   :  { %v1056_v48 = vpop.trf.xlu0 }
 0x8b2   :  { %v1072_v49 = vadd.f32 %v1071_v47, %v1070_v46 }
 0x8b4   :  { %v1073_v51 = vrot.slane %v1072_v49, 2 }
 0x8b5   :  { %v1057_v50 = vpop.trf.xlu0 }
 0x8b6   :  { %v1077_v52 = vadd.f32 %v1057_v50, %v1056_v48  ;;  %v1074_v54 = vadd.f32 %v1073_v51, %v1072_v49 }
 0x8b8   :  { %v1078_v53 = vrot.slane %v1077_v52, 4  ;;  %v1075_v57 = vrot.slane %v1074_v54, 1 }
 0x8ba   :  { %v1079_v55 = vadd.f32 %v1078_v53, %v1077_v52  ;;  %v1076_v62 = vadd.f32 %v1075_v57, %v1074_v54 }
 0x8bc   :  { %v1080_v56 = vrot.slane %v1079_v55, 2 }
 0x8be   :  { %v1081_v58 = vadd.f32 %v1080_v56, %v1079_v55 }
 0x8c0   :  { %v1082_v61 = vrot.slane %v1081_v58, 1 }
 0x8c2   :  { %v1083_v63 = vadd.f32 %v1082_v61, %v1081_v58 }
 0x8c4   :  { %v1110_v5 = vsel %vm1109_vm8, %v1083_v63, %v1076_v62 }
 0x8c5   :  { %1451 = vmatmul.mubr.f32.vlgmr.msra.gmra.mrb[12].mxu1 %v1110_v5 }
 0x8c6   :  { %1564 = vmatpush3.bf16.msra.mxu1 %v1563_v1  ;;  %1469 = vmatprep.mubr.msk.f32.mxu1 %vm1774_vm7, %v1775_v3  ;;  %v1189_v3 = vld [vmem:[%s2378_s10 + $0x30] sm:$0xff]  ;;  %s1742_s10 = scalar_lea.vmem %s1279_s20, 32 }
 0x8c7   :  { %1565 = vmatprep.subr.bf16.mxu1 %v1773_v0  ;;  %v1572_v13 = vpack.c.bf16 %v1190_v12, %v1189_v3  ;;  %p1743_p0 = scmp.ne.s32.totalorder %s1279_s20, %s1742_s10  ;;  %p1748_p2 = scmp.lt.s32.totalorder %s1742_s10, %s1742_s10 }
 0x8c9   :  { %p1749_p3 = por %p1748_p2, %p1747_p1 }
 0x8ca   :  { %1567 = vmatpush3.bf16.msra.mxu1 %v1566_v6 }
 0x8cb   :  { %1568 = vmatprep.subr.bf16.mxu1 %v1773_v0  ;;  %p1750_p4 = pnand %p1749_p3, %p1743_p0 }
 0x8ce   :  { %1570 = vmatpush3.bf16.msra.mxu1 %v1569_v11 }
 0x8cf   :  { %1571 = vmatprep.subr.bf16.mxu1 %v1773_v0  ;;  %v1318_v0 = vld [vmem:[%s2379_s11] ss:$0 sm:$0xff] }
 0x8d2   :  { %1573 = vmatpush3.bf16.msra.mxu1 %v1572_v13 }
 0x998   :  { %v1178_v15 = vpop.f32.mrb[12].mxu1 }
 0x999   :  { %v1179_v16 = vadd.f32 %v1317_v14, %v1178_v15  ;;  %v1452_v17 = vpop.f32.mrb[13].mxu1 }
 0x99b   :  { %v1182_v18 = vmax.f32 %v1179_v16, 0.0 }
 0x99d   :  { %1470 = vmatmul.mubr.msk.f32.vlgmr.msra.gmra.mrb[14].mxu1 %vm828_vm6, %v1182_v18 }
 0xa70   :  { %v1267_v19 = vpop.f32.mrb[14].mxu1 }
 0xa71   :  { %v1268_v20 = vadd.f32 %v1318_v0, %v1267_v19  ;;  %v1471_v21 = vpop.f32.mrb[15].mxu1 }
 0xa73   :  { %1271 = vst [vmem:[#allocation2] sm:$0x3] %v1268_v20 }
 0xa74   :  { %1753 = shalt.err (!%p1750_p4)
}
 0xa75   :  { %s1754_s22 = scalar_lea.hbm %s2380_s12, 32 }
 0xa76   :  { %p1755_p5 = scmp.ne.s32.totalorder %s2380_s12, %s1754_s22  ;;  %p1758_p6 = scmp.lt.u32.totalorder %s1754_s22, %s2380_s12 }
 0xa78   :  { %p1760_p7 = pnand %p1758_p6, %p1755_p5 }
 0xa7a   :  { %1763 = shalt.err (!%p1760_p7)
}
 0xa7b   :  { %1281 = dma.vmem_to_hbm [thread:$0]  %s1279_s20, 32, %s2380_s12, [#allocation3]  }
 0xa7c   :  { %1764 = dma.done.wait [#allocation3], 32  }
 0xa7d   :  { %1765 = vsyncadd [#allocation3], 4294967264 }
 0xa7e   :  { %1285 = vsyncpa [#allocation3], 1 }

</bundles_post_ra>
